<compile_context>
chip_gen: v7x
topology: tpu7x:2x2x1
jax: 0.10.0
libtpu: 0.0.40
codegen_flags: <defaults>
</compile_context>

<pallas_src>
import math

import jax
import jax.numpy as jnp
import numpy as np
from jax.experimental import pallas as pl
from jax.experimental.pallas import tpu as pltpu


def _round_up(x, m):
    return (x + m - 1) // m * m


# ---------------------------------------------------------------------------
# Fused MLP kernel: h = x; for each layer: h = h @ W + b; ReLU between layers.
# ---------------------------------------------------------------------------
def _make_mlp_kernel(num_layers):
    def kernel(*refs):
        x_ref = refs[0]
        o_ref = refs[-1]
        wb_refs = refs[1:-1]                     # (w0, b0, w1, b1, ...)
        h = x_ref[...]                           # (tile_m, d0_pad) f32
        for i in range(num_layers):
            w = wb_refs[2 * i][...]              # (d_in_pad, d_out_pad)
            b = wb_refs[2 * i + 1][...]          # (1, d_out_pad)
            h = jnp.dot(h, w, preferred_element_type=jnp.float32) + b
            if i != num_layers - 1:
                h = jnp.maximum(h, 0.0)          # ReLU
                # Dropout(p) is an identity in eval/inference mode.
        o_ref[...] = h.astype(o_ref.dtype)
    return kernel


def mlp_forward(x, weights, biases, *, max_tile_m=256,
                vmem_limit_bytes=48 * 1024 * 1024):
    """x: [..., input_size]; weights[i]: (d_in_i, d_out_i); biases[i]: (d_out_i,)."""
    num_layers = len(weights)
    assert len(biases) == num_layers

    in_dim = x.shape[-1]
    out_dim = weights[-1].shape[1]
    lead_shape = x.shape[:-1]
    rows = int(np.prod(lead_shape)) if lead_shape else 1

    # ---- pad feature dims to multiples of 128 (lane-dense, full vregs) ----
    dims = [in_dim] + [w.shape[1] for w in weights]
    dims_pad = [_round_up(d, 128) for d in dims]

    w_pad, b_pad = [], []
    for i, (w, b) in enumerate(zip(weights, biases)):
        di, do = dims_pad[i], dims_pad[i + 1]
        w_pad.append(jnp.pad(w.astype(jnp.float32),
                             ((0, di - w.shape[0]), (0, do - w.shape[1]))))
        b_pad.append(jnp.pad(b.astype(jnp.float32),
                             (0, do - b.shape[0])).reshape(1, do))

    # ---- collapse leading dims into one row axis and tile it ----
    x2 = x.reshape(rows, in_dim).astype(jnp.float32)
    tile_m = max_tile_m if rows >= max_tile_m else _round_up(rows, 8)
    rows_pad = _round_up(rows, tile_m)
    x2 = jnp.pad(x2, ((0, rows_pad - rows), (0, dims_pad[0] - in_dim)))

    grid = (rows_pad // tile_m,)

    in_specs = [pl.BlockSpec((tile_m, dims_pad[0]), lambda r: (r, 0))]
    operands = [x2]
    for i in range(num_layers):
        di, do = dims_pad[i], dims_pad[i + 1]
        # grid-invariant index maps: weights/biases stay resident in VMEM
        in_specs.append(pl.BlockSpec((di, do), lambda r: (0, 0)))
        in_specs.append(pl.BlockSpec((1, do), lambda r: (0, 0)))
        operands.append(w_pad[i])
        operands.append(b_pad[i])

    out_pad = dims_pad[-1]
    out = pl.pallas_call(
        _make_mlp_kernel(num_layers),
        out_shape=jax.ShapeDtypeStruct((rows_pad, out_pad), jnp.float32),
        grid_spec=pltpu.PrefetchScalarGridSpec(
            num_scalar_prefetch=0,
            grid=grid,
            in_specs=in_specs,
            out_specs=pl.BlockSpec((tile_m, out_pad), lambda r: (r, 0)),
        ),
        compiler_params=pltpu.CompilerParams(
            dimension_semantics=("parallel",),
            vmem_limit_bytes=vmem_limit_bytes,
        ),
    )(*operands)

    return out[:rows, :out_dim].reshape(*lead_shape, out_dim)


# ---------------------------------------------------------------------------
# Deterministic parameter construction mirroring the PyTorch init:
#   fc.weight ~ N(0, sqrt(2/idim)), fc.bias = 0.
# Stored transposed as (in, out) for the kernel.
# ---------------------------------------------------------------------------
def make_mlp_params(key, input_size, hidden_size, num_classes, num_layers):
    weights, biases = [], []
    keys = jax.random.split(key, num_layers)
    for i in range(num_layers):
        idim = input_size if i == 0 else hidden_size
        odim = num_classes if i == num_layers - 1 else hidden_size
        std = math.sqrt(2.0 / idim)
        w = jax.random.normal(keys[i], (idim, odim), jnp.float32) * std
        b = jnp.zeros((odim,), jnp.float32)
        weights.append(w)
        biases.append(b)
    return weights, biases


def mlp_reference(x, weights, biases):
    """Pure-JAX reference mirroring the PyTorch forward (eval mode)."""
    h = x.astype(jnp.float32)
    L = len(weights)
    for i, (w, b) in enumerate(zip(weights, biases)):
        h = jnp.einsum("...i,io->...o", h, w) + b
        if i != L - 1:
            h = jnp.maximum(h, 0.0)
            # Dropout -> identity in eval mode.
    return h


if __name__ == "__main__":
    # Small shapes consistent with MLP(input_size, hidden_size, num_classes, num_layers)
    batch, seq = 2, 8
    input_size, hidden_size, num_classes, num_layers = 16, 32, 8, 2

    key = jax.random.PRNGKey(0)
    kp, kx = jax.random.split(key)
    weights, biases = make_mlp_params(kp, input_size, hidden_size,
                                      num_classes, num_layers)
    x = jax.random.normal(kx, (batch, seq, input_size), jnp.float32)

    out = mlp_forward(x, weights, biases)
    out = jax.block_until_ready(out)

    ref = mlp_reference(x, weights, biases)
    assert out.shape == (batch, seq, num_classes), out.shape
    assert jnp.allclose(out, ref, atol=1e-4, rtol=1e-4), "mismatch vs reference"

    print("KERNEL_OK")
</pallas_src>

<mosaic_0001>
module attributes {stable_mosaic.version = 11 : i64} {
  func.func @kernel(%arg0: i32, %arg1: memref<16x128xf32, #tpu.memory_space<vmem>>, %arg2: memref<128x128xf32, #tpu.memory_space<vmem>>, %arg3: memref<1x128xf32, #tpu.memory_space<vmem>>, %arg4: memref<128x128xf32, #tpu.memory_space<vmem>>, %arg5: memref<1x128xf32, #tpu.memory_space<vmem>>, %arg6: memref<16x128xf32, #tpu.memory_space<vmem>>) attributes {dimension_semantics = [#tpu.dimension_semantics<parallel>], iteration_bounds = array<i64: 1>, scalar_prefetch = 0 : i64, scratch_operands = 0 : i64, tpu.core_type = #tpu.core_type<tc>, window_params = [{transform_indices = @transform_0, window_bounds = array<i64: 16, 128>}, {pipeline_mode = #tpu.pipeline_mode<synchronous>, transform_indices = @transform_1, window_bounds = array<i64: 128, 128>}, {pipeline_mode = #tpu.pipeline_mode<synchronous>, transform_indices = @transform_2, window_bounds = array<i64: 1, 128>}, {pipeline_mode = #tpu.pipeline_mode<synchronous>, transform_indices = @transform_3, window_bounds = array<i64: 128, 128>}, {pipeline_mode = #tpu.pipeline_mode<synchronous>, transform_indices = @transform_4, window_bounds = array<i64: 1, 128>}, {transform_indices = @transform_5, window_bounds = array<i64: 16, 128>}]} {
    %c0 = arith.constant 0 : index
    %c0_0 = arith.constant 0 : index
    %0 = vector.load %arg1[%c0, %c0_0] : memref<16x128xf32, #tpu.memory_space<vmem>>, vector<16x128xf32>
    %c0_1 = arith.constant 0 : index
    %c0_2 = arith.constant 0 : index
    %1 = vector.load %arg2[%c0_1, %c0_2] : memref<128x128xf32, #tpu.memory_space<vmem>>, vector<128x128xf32>
    %c0_3 = arith.constant 0 : index
    %c0_4 = arith.constant 0 : index
    %2 = vector.load %arg3[%c0_3, %c0_4] : memref<1x128xf32, #tpu.memory_space<vmem>>, vector<1x128xf32>
    %cst = arith.constant dense<0.000000e+00> : vector<16x128xf32>
    %3 = tpu.matmul %0, %1, %cst {dimension_numbers = #tpu.dot_dimension_numbers<[1], [0], [0], [1], [0, 0, 1, 1], [], []>} : vector<16x128xf32>, vector<128x128xf32>, vector<16x128xf32> -> vector<16x128xf32>
    %4 = vector.broadcast %2 : vector<1x128xf32> to vector<16x128xf32>
    %5 = arith.addf %3, %4 : vector<16x128xf32>
    %cst_5 = arith.constant 0.000000e+00 : f32
    %6 = vector.broadcast %cst_5 : f32 to vector<16x128xf32>
    %7 = arith.maximumf %5, %6 : vector<16x128xf32>
    %c0_6 = arith.constant 0 : index
    %c0_7 = arith.constant 0 : index
    %8 = vector.load %arg4[%c0_6, %c0_7] : memref<128x128xf32, #tpu.memory_space<vmem>>, vector<128x128xf32>
    %c0_8 = arith.constant 0 : index
    %c0_9 = arith.constant 0 : index
    %9 = vector.load %arg5[%c0_8, %c0_9] : memref<1x128xf32, #tpu.memory_space<vmem>>, vector<1x128xf32>
    %cst_10 = arith.constant dense<0.000000e+00> : vector<16x128xf32>
    %10 = tpu.matmul %7, %8, %cst_10 {dimension_numbers = #tpu.dot_dimension_numbers<[1], [0], [0], [1], [0, 0, 1, 1], [], []>} : vector<16x128xf32>, vector<128x128xf32>, vector<16x128xf32> -> vector<16x128xf32>
    %11 = vector.broadcast %9 : vector<1x128xf32> to vector<16x128xf32>
    %12 = arith.addf %10, %11 : vector<16x128xf32>
    %c0_11 = arith.constant 0 : index
    %c0_12 = arith.constant 0 : index
    %13 = vector.load %arg6[%c0_11, %c0_12] : memref<16x128xf32, #tpu.memory_space<vmem>>, vector<16x128xf32>
    tpu.vector_store %arg6[%c0_11, %c0_12], %12 {strides = array<i32>} : memref<16x128xf32, #tpu.memory_space<vmem>>, vector<16x128xf32>,
    return
  }
  func.func @transform_0(%arg0: i32) -> (i32, i32) {
    %c0_i32 = arith.constant 0 : i32
    %c0_i32_0 = arith.constant 0 : i32
    return %arg0, %c0_i32 : i32, i32
  }
  func.func @transform_1(%arg0: i32) -> (i32, i32) {
    %c0_i32 = arith.constant 0 : i32
    %c0_i32_0 = arith.constant 0 : i32
    %c0_i32_1 = arith.constant 0 : i32
    return %c0_i32, %c0_i32_0 : i32, i32
  }
  func.func @transform_2(%arg0: i32) -> (i32, i32) {
    %c0_i32 = arith.constant 0 : i32
    %c0_i32_0 = arith.constant 0 : i32
    %c0_i32_1 = arith.constant 0 : i32
    return %c0_i32, %c0_i32_0 : i32, i32
  }
  func.func @transform_3(%arg0: i32) -> (i32, i32) {
    %c0_i32 = arith.constant 0 : i32
    %c0_i32_0 = arith.constant 0 : i32
    %c0_i32_1 = arith.constant 0 : i32
    return %c0_i32, %c0_i32_0 : i32, i32
  }
  func.func @transform_4(%arg0: i32) -> (i32, i32) {
    %c0_i32 = arith.constant 0 : i32
    %c0_i32_0 = arith.constant 0 : i32
    %c0_i32_1 = arith.constant 0 : i32
    return %c0_i32, %c0_i32_0 : i32, i32
  }
  func.func @transform_5(%arg0: i32) -> (i32, i32) {
    %c0_i32 = arith.constant 0 : i32
    %c0_i32_0 = arith.constant 0 : i32
    return %arg0, %c0_i32 : i32, i32
  }
}

</mosaic_0001>

<bundles_post_ra>
// kernel: tpu_custom_call.1
= control target key start
LH: loop header
LB: loop body
LE: loop exit
PB: predicated region body
PF: predicated region fallthrough
CT: control target
= control target key end

     0   :  { %10 = vsyncpa [#allocation3], 0  ;;  %s663_s0 = inlined_call_operand.hbm [shape: f32[16,128], index: 0, kind: input, shape index: {}]   ;;  %s664_s1 = inlined_call_operand.hbm [shape: f32[128,128], index: 1, kind: input, shape index: {}]   ;;  %s665_s2 = inlined_call_operand.vmem [shape: f32[1,128], index: 2, kind: input, shape index: {}]   ;;  %s666_s3 = inlined_call_operand.hbm [shape: f32[128,128], index: 3, kind: input, shape index: {}]   ;;  %s667_s4 = inlined_call_operand.vmem [shape: f32[1,128], index: 4, kind: input, shape index: {}]   ;;  %s668_s5 = inlined_call_operand.hbm [shape: f32[16,128], index: 5, kind: output, shape index: {}]  }
   0x1   :  { %11 = vsyncpa [#allocation6], 0 }
   0x2   :  { %12 = vsyncpa [#allocation4], 0  ;;  %s554_s18 = smov [#allocation5]   ;;  %s555_s20 = smov [#allocation2]  }
   0x3   :  { %s30_s19 = sshll.u32 %s554_s18, 4  ;;  %s18_s21 = sshll.u32 %s555_s20, 4  ;;  %s31_s19 = int_to_ptr.vmem [resolvable:$true] %s30_s19  ;;  %s590_s21 = int_to_ptr.vmem [resolvable:$true] %s18_s21 }
   0x4   :  { %s460_s24 = scalar_lea.hbm %s664_s1, 2048 }
   0x5   :  { %p461_p0 = scmp.ne.s32.totalorder %s664_s1, %s460_s24  ;;  %p464_p1 = scmp.lt.u32.totalorder %s460_s24, %s664_s1 }
   0x7   :  { %p466_p2 = pnand %p464_p1, %p461_p0 }
   0x9   :  { %469 = shalt.err (!%p466_p2)
}
   0xa   :  { %s470_s29 = scalar_lea.vmem %s31_s19, 2048  ;;  %p475_p4 = scmp.lt.s32.totalorder %s31_s19, %s31_s19 }
   0xb   :  { %p471_p3 = scmp.ne.s32.totalorder %s31_s19, %s470_s29  ;;  %p476_p5 = scmp.lt.s32.totalorder %s470_s29, %s470_s29 }
   0xd   :  { %p477_p6 = por %p476_p5, %p475_p4 }
   0xf   :  { %p478_p7 = pnand %p477_p6, %p471_p3 }
  0x11   :  { %481 = shalt.err (!%p478_p7)
}
  0x12   :  { %s556_s30 = smov 128   ;;  %s557_s6 = smov 8  }
  0x13   :  { %36 = dma.hbm_to_vmem [thread:$0]  %s664_s1, 2048, %s31_s19, [#allocation6], %s556_s30, %s556_s30, %s557_s6  }
  0x14   :  { %s482_s11 = scalar_lea.hbm %s663_s0, 256 }
  0x15   :  { %p483_p8 = scmp.ne.s32.totalorder %s663_s0, %s482_s11  ;;  %p486_p9 = scmp.lt.u32.totalorder %s482_s11, %s663_s0 }
  0x17   :  { %p488_p10 = pnand %p486_p9, %p483_p8 }
  0x19   :  { %491 = shalt.err (!%p488_p10)
}
  0x1a   :  { %s492_s16 = scalar_lea.vmem %s590_s21, 256  ;;  %p497_p12 = scmp.lt.s32.totalorder %s590_s21, %s590_s21 }
  0x1b   :  { %p493_p11 = scmp.ne.s32.totalorder %s590_s21, %s492_s16  ;;  %p498_p13 = scmp.lt.s32.totalorder %s492_s16, %s492_s16 }
  0x1d   :  { %p499_p0 = por %p498_p13, %p497_p12 }
  0x1f   :  { %p500_p1 = pnand %p499_p0, %p493_p11 }
  0x21   :  { %503 = shalt.err (!%p500_p1)
}
  0x22   :  { %24 = dma.hbm_to_vmem [thread:$0]  %s663_s0, 256, %s590_s21, [#allocation3], %s556_s30, %s556_s30, %s557_s6  }
  0x23   :  { %s558_s18 = smov [#allocation7]   ;;  %s504_s23 = scalar_lea.hbm %s666_s3, 2048 }
  0x24   :  { %s44_s19 = sshll.u32 %s558_s18, 4  ;;  %p505_p2 = scmp.ne.s32.totalorder %s666_s3, %s504_s23  ;;  %s45_s19 = int_to_ptr.vmem [resolvable:$true] %s44_s19 }
  0x25   :  { %p508_p3 = scmp.lt.u32.totalorder %s504_s23, %s666_s3 }
  0x27   :  { %p510_p4 = pnand %p508_p3, %p505_p2 }
  0x29   :  { %513 = shalt.err (!%p510_p4)
}
  0x2a   :  { %s514_s28 = scalar_lea.vmem %s45_s19, 2048  ;;  %p519_p6 = scmp.lt.s32.totalorder %s45_s19, %s45_s19 }
  0x2b   :  { %p515_p5 = scmp.ne.s32.totalorder %s45_s19, %s514_s28  ;;  %p520_p7 = scmp.lt.s32.totalorder %s514_s28, %s514_s28 }
  0x2d   :  { %p521_p8 = por %p520_p7, %p519_p6 }
  0x2f   :  { %p522_p9 = pnand %p521_p8, %p515_p5 }
  0x31   :  { %525 = shalt.err (!%p522_p9)
}
  0x32   :  { %50 = dma.hbm_to_vmem [thread:$0]  %s666_s3, 2048, %s45_s19, [#allocation6], %s556_s30, %s556_s30, %s557_s6  }
  0x33   :  { %548 = dma.done.wait [#allocation3], 256  }
  0x34   :  { %549 = vsyncadd [#allocation3], 4294967040 }
  0x35   :  { %550 = dma.done.wait [#allocation6], 4096  }
  0x36   :  { %551 = vsyncadd [#allocation6], 4294963200  ;;  %v64_v0 = vld [vmem:[#allocation5] sm:$0xff]  ;;  %v65_v1 = vld [vmem:[#allocation5 + $0x8] sm:$0xff]  ;;  %s559_s9 = smov [#allocation8]  }
  0x37   :  { %v66_v2 = vld [vmem:[#allocation5 + $0x10] sm:$0xff]  ;;  %v390_v3 = vpack.c.bf16 %v65_v1, %v64_v0  ;;  %v67_v4 = vld [vmem:[#allocation5 + $0x18] sm:$0xff]  ;;  %v68_v6 = vld [vmem:[#allocation5 + $0x20] sm:$0xff]  ;;  %s269_s10 = sshll.u32 %s559_s9, 4  ;;  %s270_s10 = int_to_ptr.vmem [resolvable:$true] %s269_s10 }
  0x38   :  { %v394_v5 = vpack.c.bf16 %v67_v4, %v66_v2  ;;  %v69_v7 = vld [vmem:[#allocation5 + $0x28] sm:$0xff]  ;;  %v70_v9 = vld [vmem:[#allocation5 + $0x30] sm:$0xff]  ;;  %v71_v10 = vld [vmem:[#allocation5 + $0x38] sm:$0xff]  ;;  %p531_p11 = scmp.lt.s32.totalorder %s270_s10, %s270_s10 }
  0x39   :  { %391 = vmatprep.subr.bf16.mxu0 %v390_v3  ;;  %v398_v8 = vpack.c.bf16 %v69_v7, %v68_v6  ;;  %v62_v11 = vld [vmem:[#allocation2] sm:$0xff]  ;;  %v164_v12 = vld [vmem:[#allocation7] sm:$0xff]  ;;  %v165_v13 = vld [vmem:[#allocation7 + $0x8] sm:$0xff]  ;;  %v402_v20 = vpack.c.bf16 %v71_v10, %v70_v9 }
  0x3a   :  { %393 = vmatpush3.bf16.msra.mxu0 %v390_v3  ;;  %352 = vmatprep.mubr.f32.mxu0 %v62_v11  ;;  %v166_v14 = vld [vmem:[#allocation7 + $0x10] sm:$0xff]  ;;  %v422_v15 = vpack.c.bf16 %v165_v13, %v164_v12  ;;  %v167_v16 = vld [vmem:[#allocation7 + $0x18] sm:$0xff]  ;;  %v168_v18 = vld [vmem:[#allocation7 + $0x20] sm:$0xff] }
  0x3b   :  { %395 = vmatprep.subr.bf16.mxu0 %v394_v5  ;;  %v426_v17 = vpack.c.bf16 %v167_v16, %v166_v14  ;;  %v169_v19 = vld [vmem:[#allocation7 + $0x28] sm:$0xff]  ;;  %v72_v21 = vld [vmem:[#allocation5 + $0x40] sm:$0xff]  ;;  %v170_v24 = vld [vmem:[#allocation7 + $0x30] sm:$0xff] }
  0x3c   :  { %423 = vmatprep.subr.bf16.mxu1 %v422_v15  ;;  %v73_v22 = vld [vmem:[#allocation5 + $0x48] sm:$0xff]  ;;  %v430_v23 = vpack.c.bf16 %v169_v19, %v168_v18  ;;  %v171_v25 = vld [vmem:[#allocation7 + $0x38] sm:$0xff]  ;;  %v74_v27 = vld [vmem:[#allocation5 + $0x50] sm:$0xff] }
  0x3d   :  { %425 = vmatpush3.bf16.msra.mxu1 %v422_v15  ;;  %v406_v26 = vpack.c.bf16 %v73_v22, %v72_v21  ;;  %v75_v28 = vld [vmem:[#allocation5 + $0x58] sm:$0xff]  ;;  %v434_v29 = vpack.c.bf16 %v171_v25, %v170_v24  ;;  %v172_v30 = vld [vmem:[#allocation7 + $0x40] sm:$0xff]  ;;  %v173_v31 = vld [vmem:[#allocation7 + $0x48] sm:$0xff] }
  0x3e   :  { %397 = vmatpush3.bf16.msra.mxu0 %v394_v5  ;;  %427 = vmatprep.subr.bf16.mxu1 %v426_v17  ;;  %v410_v32 = vpack.c.bf16 %v75_v28, %v74_v27  ;;  %v76_v33 = vld [vmem:[#allocation5 + $0x60] sm:$0xff]  ;;  %v77_v34 = vld [vmem:[#allocation5 + $0x68] sm:$0xff]  ;;  %v438_v35 = vpack.c.bf16 %v173_v31, %v172_v30  ;;  %v174_v36 = vld [vmem:[#allocation7 + $0x50] sm:$0xff] }
  0x3f   :  { %399 = vmatprep.subr.bf16.mxu0 %v398_v8  ;;  %v175_v37 = vld [vmem:[#allocation7 + $0x58] sm:$0xff]  ;;  %v414_v38 = vpack.c.bf16 %v77_v34, %v76_v33  ;;  %v78_v39 = vld [vmem:[#allocation5 + $0x70] sm:$0xff]  ;;  %v176_v42 = vld [vmem:[#allocation7 + $0x60] sm:$0xff] }
  0x40   :  { %v79_v40 = vld [vmem:[#allocation5 + $0x78] sm:$0xff]  ;;  %v442_v41 = vpack.c.bf16 %v175_v37, %v174_v36  ;;  %v177_v43 = vld [vmem:[#allocation7 + $0x68] sm:$0xff]  ;;  %v178_v47 = vld [vmem:[#allocation7 + $0x70] sm:$0xff] }
  0x41   :  { %429 = vmatpush3.bf16.msra.mxu1 %v426_v17  ;;  %v418_v44 = vpack.c.bf16 %v79_v40, %v78_v39  ;;  %v446_v45 = vpack.c.bf16 %v177_v43, %v176_v42  ;;  %v63_v46 = vld [vmem:[#allocation2 + $0x8] sm:$0xff]  ;;  %v282_v50 = vld [vmem:[%s665_s2] ss:$0 sm:$0xff]  ;;  %s526_s2 = scalar_lea.vmem %s270_s10, 256 }
  0x42   :  { %401 = vmatpush3.bf16.msra.mxu0 %v398_v8  ;;  %431 = vmatprep.subr.bf16.mxu1 %v430_v23  ;;  %v179_v48 = vld [vmem:[#allocation7 + $0x78] sm:$0xff]  ;;  %v283_v57 = vld [vmem:[%s667_s4] ss:$0 sm:$0xff]  ;;  %p527_p10 = scmp.ne.s32.totalorder %s270_s10, %s526_s2  ;;  %p532_p12 = scmp.lt.s32.totalorder %s526_s2, %s526_s2 }
  0x43   :  { %403 = vmatprep.subr.bf16.mxu0 %v402_v20  ;;  %v450_v49 = vpack.c.bf16 %v179_v48, %v178_v47 }
  0x44   :  { %p533_p13 = por %p532_p12, %p531_p11 }
  0x45   :  { %433 = vmatpush3.bf16.msra.mxu1 %v430_v23 }
  0x46   :  { %405 = vmatpush3.bf16.msra.mxu0 %v402_v20  ;;  %435 = vmatprep.subr.bf16.mxu1 %v434_v29  ;;  %p534_p0 = pnand %p533_p13, %p527_p10 }
  0x47   :  { %407 = vmatprep.subr.bf16.mxu0 %v406_v26 }
  0x49   :  { %437 = vmatpush3.bf16.msra.mxu1 %v434_v29 }
  0x4a   :  { %409 = vmatpush3.bf16.msra.mxu0 %v406_v26  ;;  %439 = vmatprep.subr.bf16.mxu1 %v438_v35 }
  0x4b   :  { %411 = vmatprep.subr.bf16.mxu0 %v410_v32 }
  0x4d   :  { %441 = vmatpush3.bf16.msra.mxu1 %v438_v35 }
  0x4e   :  { %413 = vmatpush3.bf16.msra.mxu0 %v410_v32  ;;  %443 = vmatprep.subr.bf16.mxu1 %v442_v41 }
  0x4f   :  { %415 = vmatprep.subr.bf16.mxu0 %v414_v38 }
  0x51   :  { %445 = vmatpush3.bf16.msra.mxu1 %v442_v41 }
  0x52   :  { %417 = vmatpush3.bf16.msra.mxu0 %v414_v38  ;;  %447 = vmatprep.subr.bf16.mxu1 %v446_v45 }
  0x53   :  { %419 = vmatprep.subr.bf16.mxu0 %v418_v44 }
  0x55   :  { %449 = vmatpush3.bf16.msra.mxu1 %v446_v45 }
  0x56   :  { %421 = vmatpush3.bf16.msra.mxu0 %v418_v44  ;;  %451 = vmatprep.subr.bf16.mxu1 %v450_v49 }
  0x59   :  { %353 = vmatmul.mubr.f32.vlgmr.msra.gmra.mrb[0].mxu0 %v63_v46  ;;  %453 = vmatpush3.bf16.msra.mxu1 %v450_v49 }
 0x12c   :  { %v354_v51 = vpop.f32.mrb[0].mxu0 }
 0x12d   :  { %v159_v52 = vadd.f32 %v354_v51, %v282_v50  ;;  %v153_v53 = vpop.f32.mrb[1].mxu0 }
 0x12e   :  { %v154_v54 = vadd.f32 %v282_v50, %v153_v53 }
 0x12f   :  { %v163_v56 = vmax.f32 %v159_v52, 0.0 }
 0x130   :  { %v162_v55 = vmax.f32 %v154_v54, 0.0 }
 0x132   :  { %387 = vmatprep.mubr.f32.mxu1 %v162_v55 }
 0x133   :  { %388 = vmatmul.mubr.f32.vlgmr.msra.gmra.mrb[0].mxu1 %v163_v56 }
 0x206   :  { %v389_v58 = vpop.f32.mrb[0].mxu1 }
 0x207   :  { %v259_v59 = vadd.f32 %v389_v58, %v283_v57  ;;  %v253_v60 = vpop.f32.mrb[1].mxu1 }
 0x208   :  { %v254_v61 = vadd.f32 %v283_v57, %v253_v60 }
 0x209   :  { %263 = vst [vmem:[#allocation8 + $0x8] sm:$0xff] %v259_v59 }
 0x20a   :  { %262 = vst [vmem:[#allocation8] sm:$0xff] %v254_v61 }
 0x20b   :  { %537 = shalt.err (!%p534_p0)
}
 0x20c   :  { %s538_s4 = scalar_lea.hbm %s668_s5, 256 }
 0x20d   :  { %p539_p1 = scmp.ne.s32.totalorder %s668_s5, %s538_s4  ;;  %p542_p2 = scmp.lt.u32.totalorder %s538_s4, %s668_s5 }
 0x20f   :  { %p544_p3 = pnand %p542_p2, %p539_p1 }
 0x211   :  { %547 = shalt.err (!%p544_p3)
}
 0x212   :  { %275 = dma.vmem_to_hbm [thread:$0]  %s270_s10, 256, %s668_s5, [#allocation4], %s556_s30, %s556_s30, %s557_s6  }
 0x213   :  { %552 = dma.done.wait [#allocation4], 256  }
 0x214   :  { %553 = vsyncadd [#allocation4], 4294967040 }
 0x215   :  { %279 = vsyncpa [#allocation3], 1 }
 0x216   :  { %280 = vsyncpa [#allocation6], 1 }
 0x217   :  { %281 = vsyncpa [#allocation4], 1 }

</bundles_post_ra>
